<compile_context>
chip_gen: v7x
topology: tpu7x:2x2x1
jax: 0.10.0
libtpu: 0.0.40
codegen_flags: <defaults>
</compile_context>

<pallas_src>
import functools

import jax
import jax.numpy as jnp
from jax import lax
from jax.experimental import pallas as pl
from jax.experimental.pallas import tpu as pltpu

_NEG_LARGE = -1e30  # finite "minus infinity" for padded class columns


def _round_up(v, m):
    return ((v + m - 1) // m) * m


def _usable_vmem_bytes():
    """~75% of per-core VMEM: ~48 MiB on v7x, ~96 MiB on v5e/v6e."""
    cap = 128 * 1024 * 1024
    try:
        cap = int(getattr(pltpu.get_tpu_info(), "vmem_capacity_bytes", cap))
    except Exception:
        pass
    return (3 * cap) // 4


def _tile_vmem_bytes(block_m, block_c, x_elt):
    x_blocks = 2 * block_m * block_c * x_elt   # double-buffered input block
    f32_tmp = 2 * block_m * block_c * 4        # `out` + exp full-tile temporaries
    small = 8 * block_m * 4                    # y / out blocks + 3 scratch columns
    return x_blocks + f32_tmp + small


def _am_softmax_kernel(x_ref, y_ref, o_ref, m_sc, l_sc, t_sc, *,
                       scale, margin, n_rows, n_cols, block_m, block_c,
                       rows_aligned, cols_aligned):
    bi = pl.program_id(0)          # batch tile   (parallel)
    ci = pl.program_id(1)          # class tile   (reduction axis, last)
    num_c = pl.num_programs(1)

    @pl.when(ci == 0)
    def _init():
        m_sc[...] = jnp.full_like(m_sc, -jnp.inf)
        l_sc[...] = jnp.zeros_like(l_sc)
        t_sc[...] = jnp.zeros_like(t_sc)

    x = x_ref[...].astype(jnp.float32)                              # (TM, TC)

    # Local [0, block_c) lane iota compared against the *shifted* label, so no
    # full-tile `ci * block_c` offset add is needed.
    col_local = lax.broadcasted_iota(jnp.int32, (block_m, block_c), 1)
    y_local = y_ref[...] - ci * block_c                             # (TM, 1)
    is_target = col_local == y_local                                # (TM, TC)

    # out = scale * (x - margin * onehot)  — without materializing the one-hot.
    out = scale * jnp.where(is_target, x - margin, x)
    if not cols_aligned:
        # Ragged class axis: push padded columns to ~-inf (scalar compare).
        out = jnp.where(col_local < (n_cols - ci * block_c), out, _NEG_LARGE)

    # Online logsumexp across class tiles.
    m_prev = m_sc[...]
    m_new = jnp.maximum(m_prev, jnp.max(out, axis=-1, keepdims=True))
    alpha = jnp.exp(m_prev - m_new)
    l_sc[...] = alpha * l_sc[...] + jnp.sum(jnp.exp(out - m_new),
                                            axis=-1, keepdims=True)
    m_sc[...] = m_new

    # Target logit: exactly one matching column across all class tiles.
    # TODO(synk): PyTorch CrossEntropyLoss raises on labels outside [0, C);
    # here such labels silently contribute no target term.
    t_sc[...] = t_sc[...] + jnp.sum(jnp.where(is_target, out, 0.0),
                                    axis=-1, keepdims=True)

    @pl.when(ci == num_c - 1)
    def _finalize():
        per_sample = m_sc[...] + jnp.log(l_sc[...]) - t_sc[...]     # (TM, 1)
        if not rows_aligned:
            row = bi * block_m + lax.broadcasted_iota(jnp.int32, (block_m, 1), 0)
            per_sample = jnp.where(row < n_rows, per_sample, 0.0)
        o_ref[...] = per_sample.astype(o_ref.dtype)


def am_softmax_loss(x, y, scale, margin, *, block_m=None, block_c=None):
    """x: (N, C) float32/bfloat16 logits, y: (N,) int labels -> scalar f32 loss."""
    n, c = x.shape
    y2d = y.astype(jnp.int32).reshape(n, 1)
    x_elt = jnp.dtype(x.dtype).itemsize
    sublane = 16 if x.dtype == jnp.bfloat16 else 8

    usable = _usable_vmem_bytes()
    # Bytes per (block_m x block_c) element: double-buffered x block plus two
    # full-tile f32 temporaries (`out`, exp) that the two-pass LSE materializes.
    per_elem = 2 * x_elt + 8

    # Class tile: whole class axis when reasonable, else a lane-dense chunk.
    if block_c is None:
        block_c = c if c <= 16384 else 8192
        while block_c != c and block_c > 2048 and 64 * block_c * per_elem > usable:
            block_c //= 2
    if block_c != c and block_c % 128 != 0:
        raise ValueError("block_c must equal C or be a multiple of 128")

    # Batch tile: largest that keeps the full working set inside the budget.
    if block_m is None:
        bm = (usable - (4 << 20)) // (block_c * per_elem)
        bm = min(1024, max(sublane, (bm // sublane) * sublane))
        if bm >= n:
            if n > sublane:
                # Keep >= 2 batch blocks so both v7x TensorCores get work
                # (negligible cost on single-TC v5e/v6e).
                bm = _round_up(pl.cdiv(n, 2), sublane)
            else:
                bm = _round_up(n, sublane)
        block_m = bm
    if block_m != n and block_m % sublane != 0:
        raise ValueError(
            f"block_m must equal N or be a multiple of {sublane} for {x.dtype}")

    est = _tile_vmem_bytes(block_m, block_c, x_elt)
    if est > usable:
        raise ValueError(
            f"tiles ({block_m}, {block_c}) need ~{est >> 20} MiB of VMEM, over "
            f"the ~{usable >> 20} MiB budget on this chip; shrink block_m/block_c")
    vmem_limit = int(min(max(32 * 1024 * 1024, est + (4 << 20)), usable))

    grid = (pl.cdiv(n, block_m), pl.cdiv(c, block_c))

    kernel = functools.partial(
        _am_softmax_kernel,
        scale=float(scale), margin=float(margin),
        n_rows=n, n_cols=c, block_m=block_m, block_c=block_c,
        rows_aligned=(n % block_m == 0), cols_aligned=(c % block_c == 0))

    cost = pl.CostEstimate(
        flops=8 * n * c,
        transcendentals=n * c,
        bytes_accessed=n * c * x_elt + 2 * n * 4)

    per_sample = pl.pallas_call(
        kernel,
        out_shape=jax.ShapeDtypeStruct((n, 1), jnp.float32),
        grid_spec=pltpu.PrefetchScalarGridSpec(
            num_scalar_prefetch=0,
            grid=grid,
            in_specs=[
                pl.BlockSpec((block_m, block_c), lambda i, j: (i, j)),
                pl.BlockSpec((block_m, 1), lambda i, j: (i, 0)),
            ],
            out_specs=pl.BlockSpec((block_m, 1), lambda i, j: (i, 0)),
            scratch_shapes=[pltpu.VMEM((block_m, 1), jnp.float32)] * 3,
        ),
        compiler_params=pltpu.CompilerParams(
            dimension_semantics=("parallel", "arbitrary"),
            vmem_limit_bytes=vmem_limit),
        cost_estimate=cost,
    )(x, y2d)

    # CrossEntropyLoss default reduction: mean over the global batch.
    return jnp.sum(per_sample) / jnp.float32(n)


def _reference(x, y, scale, margin):
    onehot = jax.nn.one_hot(y, x.shape[1], dtype=jnp.float32)
    out = scale * (x.astype(jnp.float32) - margin * onehot)
    lse = jax.nn.logsumexp(out, axis=-1)
    tgt = jnp.take_along_axis(out, y[:, None].astype(jnp.int32), axis=1)[:, 0]
    return jnp.mean(lse - tgt)


if __name__ == "__main__":
    key = jax.random.PRNGKey(0)
    kx, ky, kx2, ky2, kx3, ky3 = jax.random.split(key, 6)
    scale, margin = 30.0, 0.4

    # Case 1: small f32, aligned tiles -> static mask elision + the forced
    # 2-block batch axis (megacore path).
    N, C = 16, 64
    x = jax.random.normal(kx, (N, C), dtype=jnp.float32)
    y = jax.random.randint(ky, (N,), 0, C, dtype=jnp.int32)
    loss = am_softmax_loss(x, y, scale, margin)
    jax.block_until_ready(loss)
    ref = _reference(x, y, scale, margin)
    assert jnp.allclose(loss, ref, rtol=1e-5, atol=1e-4), (loss, ref)

    # Case 2: ragged batch AND class axes -> online LSE across class tiles plus
    # both padding-mask paths (N % block_m != 0, C % block_c != 0).
    N2, C2 = 20, 200
    x2 = jax.random.normal(kx2, (N2, C2), dtype=jnp.float32)
    y2 = jax.random.randint(ky2, (N2,), 0, C2, dtype=jnp.int32)
    loss2 = am_softmax_loss(x2, y2, scale, margin, block_m=8, block_c=128)
    jax.block_until_ready(loss2)
    ref2 = _reference(x2, y2, scale, margin)
    assert jnp.allclose(loss2, ref2, rtol=1e-5, atol=1e-4), (loss2, ref2)

    # Case 3: bfloat16 logits -> 16-row sublane tiling, in-kernel f32 upcast.
    N3, C3 = 32, 160
    x3 = jax.random.normal(kx3, (N3, C3), dtype=jnp.float32).astype(jnp.bfloat16)
    y3 = jax.random.randint(ky3, (N3,), 0, C3, dtype=jnp.int32)
    loss3 = am_softmax_loss(x3, y3, scale, margin)
    jax.block_until_ready(loss3)
    ref3 = _reference(x3, y3, scale, margin)
    assert jnp.allclose(loss3, ref3, rtol=1e-5, atol=1e-3), (loss3, ref3)

    print("KERNEL_OK")
</pallas_src>

<mosaic_0001>
module attributes {stable_mosaic.version = 11 : i64} {
  func.func @_am_softmax_kernel(%arg0: i32, %arg1: i32, %arg2: memref<8x64xf32, #tpu.memory_space<vmem>>, %arg3: memref<8x1xi32, #tpu.memory_space<vmem>>, %arg4: memref<8x1xf32, #tpu.memory_space<vmem>>, %arg5: memref<8x1xf32, #tpu.memory_space<vmem>>, %arg6: memref<8x1xf32, #tpu.memory_space<vmem>>, %arg7: memref<8x1xf32, #tpu.memory_space<vmem>>) attributes {dimension_semantics = [#tpu.dimension_semantics<parallel>, #tpu.dimension_semantics<arbitrary>], iteration_bounds = array<i64: 2, 1>, scalar_prefetch = 0 : i64, scratch_operands = 3 : i64, tpu.core_type = #tpu.core_type<tc>, window_params = [{transform_indices = @transform_0, window_bounds = array<i64: 8, 64>}, {transform_indices = @transform_1, window_bounds = array<i64: 8, 1>}, {transform_indices = @transform_2, window_bounds = array<i64: 8, 1>}]} {
    %c0_i32 = arith.constant 0 : i32
    %0 = arith.cmpi eq, %arg1, %c0_i32 : i32
    %1 = arith.extui %0 : i1 to i32
    %c0_i32_0 = arith.constant 0 : i32
    %2 = arith.cmpi ne, %1, %c0_i32_0 : i32
    scf.if %2 {
      %cst_23 = arith.constant 0xFF800000 : f32
      %42 = vector.broadcast %cst_23 : f32 to vector<8x1xf32>
      %c0_24 = arith.constant 0 : index
      %c0_25 = arith.constant 0 : index
      %43 = vector.load %arg5[%c0_24, %c0_25] : memref<8x1xf32, #tpu.memory_space<vmem>>, vector<8x1xf32>
      tpu.vector_store %arg5[%c0_24, %c0_25], %42 {strides = array<i32>} : memref<8x1xf32, #tpu.memory_space<vmem>>, vector<8x1xf32>,
      %cst_26 = arith.constant 0.000000e+00 : f32
      %44 = vector.broadcast %cst_26 : f32 to vector<8x1xf32>
      %c0_27 = arith.constant 0 : index
      %c0_28 = arith.constant 0 : index
      %45 = vector.load %arg6[%c0_27, %c0_28] : memref<8x1xf32, #tpu.memory_space<vmem>>, vector<8x1xf32>
      tpu.vector_store %arg6[%c0_27, %c0_28], %44 {strides = array<i32>} : memref<8x1xf32, #tpu.memory_space<vmem>>, vector<8x1xf32>,
      %cst_29 = arith.constant 0.000000e+00 : f32
      %46 = vector.broadcast %cst_29 : f32 to vector<8x1xf32>
      %c0_30 = arith.constant 0 : index
      %c0_31 = arith.constant 0 : index
      %47 = vector.load %arg7[%c0_30, %c0_31] : memref<8x1xf32, #tpu.memory_space<vmem>>, vector<8x1xf32>
      tpu.vector_store %arg7[%c0_30, %c0_31], %46 {strides = array<i32>} : memref<8x1xf32, #tpu.memory_space<vmem>>, vector<8x1xf32>,
    } else {
    }
    %c0 = arith.constant 0 : index
    %c0_1 = arith.constant 0 : index
    %3 = vector.load %arg2[%c0, %c0_1] : memref<8x64xf32, #tpu.memory_space<vmem>>, vector<8x64xf32>
    %4 = tpu.iota {dimensions = array<i32: 1>} : vector<8x64xi32>
    %c0_2 = arith.constant 0 : index
    %c0_3 = arith.constant 0 : index
    %5 = vector.load %arg3[%c0_2, %c0_3] : memref<8x1xi32, #tpu.memory_space<vmem>>, vector<8x1xi32>
    %c64_i32 = arith.constant 64 : i32
    %6 = arith.muli %arg1, %c64_i32 : i32
    %7 = vector.broadcast %6 : i32 to vector<8x1xi32>
    %8 = arith.subi %5, %7 : vector<8x1xi32>
    %9 = vector.broadcast %8 : vector<8x1xi32> to vector<8x64xi32>
    %10 = arith.cmpi eq, %4, %9 : vector<8x64xi32>
    %cst = arith.constant 4.000000e-01 : f32
    %11 = vector.broadcast %cst : f32 to vector<8x64xf32>
    %12 = arith.subf %3, %11 : vector<8x64xf32>
    %13 = arith.select %10, %12, %3 : vector<8x64xi1>, vector<8x64xf32>
    %cst_4 = arith.constant 3.000000e+01 : f32
    %14 = vector.broadcast %cst_4 : f32 to vector<8x64xf32>
    %15 = arith.mulf %14, %13 : vector<8x64xf32>
    %c0_5 = arith.constant 0 : index
    %c0_6 = arith.constant 0 : index
    %16 = vector.load %arg5[%c0_5, %c0_6] : memref<8x1xf32, #tpu.memory_space<vmem>>, vector<8x1xf32>
    %cst_7 = arith.constant dense<0xFF800000> : vector<8xf32>
    %17 = vector.multi_reduction <maximumf>, %15, %cst_7 [1] : vector<8x64xf32> to vector<8xf32>
    %18 = vector.shape_cast %17 : vector<8xf32> to vector<8x1xf32>
    %19 = arith.maximumf %16, %18 : vector<8x1xf32>
    %20 = arith.subf %16, %19 : vector<8x1xf32>
    %21 = math.exp %20 : vector<8x1xf32>
    %c0_8 = arith.constant 0 : index
    %c0_9 = arith.constant 0 : index
    %22 = vector.load %arg6[%c0_8, %c0_9] : memref<8x1xf32, #tpu.memory_space<vmem>>, vector<8x1xf32>
    %23 = arith.mulf %21, %22 : vector<8x1xf32>
    %24 = vector.broadcast %19 : vector<8x1xf32> to vector<8x64xf32>
    %25 = arith.subf %15, %24 : vector<8x64xf32>
    %26 = math.exp %25 : vector<8x64xf32>
    %cst_10 = arith.constant dense<0.000000e+00> : vector<8xf32>
    %27 = vector.multi_reduction <add>, %26, %cst_10 [1] : vector<8x64xf32> to vector<8xf32>
    %28 = vector.shape_cast %27 : vector<8xf32> to vector<8x1xf32>
    %29 = arith.addf %23, %28 : vector<8x1xf32>
    %c0_11 = arith.constant 0 : index
    %c0_12 = arith.constant 0 : index
    %30 = vector.load %arg6[%c0_11, %c0_12] : memref<8x1xf32, #tpu.memory_space<vmem>>, vector<8x1xf32>
    tpu.vector_store %arg6[%c0_11, %c0_12], %29 {strides = array<i32>} : memref<8x1xf32, #tpu.memory_space<vmem>>, vector<8x1xf32>,
    %c0_13 = arith.constant 0 : index
    %c0_14 = arith.constant 0 : index
    %31 = vector.load %arg5[%c0_13, %c0_14] : memref<8x1xf32, #tpu.memory_space<vmem>>, vector<8x1xf32>
    tpu.vector_store %arg5[%c0_13, %c0_14], %19 {strides = array<i32>} : memref<8x1xf32, #tpu.memory_space<vmem>>, vector<8x1xf32>,
    %c0_15 = arith.constant 0 : index
    %c0_16 = arith.constant 0 : index
    %32 = vector.load %arg7[%c0_15, %c0_16] : memref<8x1xf32, #tpu.memory_space<vmem>>, vector<8x1xf32>
    %cst_17 = arith.constant 0.000000e+00 : f32
    %33 = vector.broadcast %cst_17 : f32 to vector<8x64xf32>
    %34 = arith.select %10, %15, %33 : vector<8x64xi1>, vector<8x64xf32>
    %cst_18 = arith.constant dense<0.000000e+00> : vector<8xf32>
    %35 = vector.multi_reduction <add>, %34, %cst_18 [1] : vector<8x64xf32> to vector<8xf32>
    %36 = vector.shape_cast %35 : vector<8xf32> to vector<8x1xf32>
    %37 = arith.addf %32, %36 : vector<8x1xf32>
    %c0_19 = arith.constant 0 : index
    %c0_20 = arith.constant 0 : index
    %38 = vector.load %arg7[%c0_19, %c0_20] : memref<8x1xf32, #tpu.memory_space<vmem>>, vector<8x1xf32>
    tpu.vector_store %arg7[%c0_19, %c0_20], %37 {strides = array<i32>} : memref<8x1xf32, #tpu.memory_space<vmem>>, vector<8x1xf32>,
    %c0_i32_21 = arith.constant 0 : i32
    %39 = arith.cmpi eq, %arg1, %c0_i32_21 : i32
    %40 = arith.extui %39 : i1 to i32
    %c0_i32_22 = arith.constant 0 : i32
    %41 = arith.cmpi ne, %40, %c0_i32_22 : i32
    scf.if %41 {
      %c0_23 = arith.constant 0 : index
      %c0_24 = arith.constant 0 : index
      %42 = vector.load %arg5[%c0_23, %c0_24] : memref<8x1xf32, #tpu.memory_space<vmem>>, vector<8x1xf32>
      %c0_25 = arith.constant 0 : index
      %c0_26 = arith.constant 0 : index
      %43 = vector.load %arg6[%c0_25, %c0_26] : memref<8x1xf32, #tpu.memory_space<vmem>>, vector<8x1xf32>
      %44 = math.log %43 : vector<8x1xf32>
      %45 = arith.addf %42, %44 : vector<8x1xf32>
      %c0_27 = arith.constant 0 : index
      %c0_28 = arith.constant 0 : index
      %46 = vector.load %arg7[%c0_27, %c0_28] : memref<8x1xf32, #tpu.memory_space<vmem>>, vector<8x1xf32>
      %47 = arith.subf %45, %46 : vector<8x1xf32>
      %c0_29 = arith.constant 0 : index
      %c0_30 = arith.constant 0 : index
      %48 = vector.load %arg4[%c0_29, %c0_30] : memref<8x1xf32, #tpu.memory_space<vmem>>, vector<8x1xf32>
      tpu.vector_store %arg4[%c0_29, %c0_30], %47 {strides = array<i32>} : memref<8x1xf32, #tpu.memory_space<vmem>>, vector<8x1xf32>,
    } else {
    }
    return
  }
  func.func @transform_0(%arg0: i32, %arg1: i32) -> (i32, i32) {
    %c0_i32 = arith.constant 0 : i32
    return %arg0, %arg1 : i32, i32
  }
  func.func @transform_1(%arg0: i32, %arg1: i32) -> (i32, i32) {
    %c0_i32 = arith.constant 0 : i32
    %c0_i32_0 = arith.constant 0 : i32
    return %arg0, %c0_i32 : i32, i32
  }
  func.func @transform_2(%arg0: i32, %arg1: i32) -> (i32, i32) {
    %c0_i32 = arith.constant 0 : i32
    %c0_i32_0 = arith.constant 0 : i32
    return %arg0, %c0_i32 : i32, i32
  }
}

</mosaic_0001>

<bundles_post_ra>
// kernel: tpu_custom_call.1
= control target key start
LH: loop header
LB: loop body
LE: loop exit
PB: predicated region body
PF: predicated region fallthrough
CT: control target
= control target key end

     0   :  { %s409_s9 = smov 0   ;;  %s411_s10 = smov 0   ;;  %s460_s0 = inlined_call_operand.vmem [shape: f32[16,64], index: 0, kind: input, shape index: {}]   ;;  %s461_s1 = inlined_call_operand.vmem [shape: s32[16,1], index: 1, kind: input, shape index: {}]   ;;  %s462_s2 = inlined_call_operand.vmem [shape: f32[16,1], index: 2, kind: output, shape index: {}]  }
   0x1   :  { %s413_s11 = smov 0  }
   0x2 LB: > { %s24_s12 = sadd.s32 1, %s385_s10  ;;  %p325_p0 = scmp.ge.s32.totalorder %s389_s11, 1  ;;  %s389_s11 = sphi %s413_s11, %s12_s11   ;;  %s385_s10 = sphi %s411_s10, %s464_s10   ;;  %s381_s9 = sphi %s409_s9, %s463_s9  }
   0x3   : > { %p26_p1 = scmp.ge.s32.totalorder %s24_s12, 2  ;;  %p137_p2 = scmp.lt.s32.totalorder %s389_s11, 3 }
   0x5   : > { %s466_s12 = smov (%p26_p1, %s24_s12), 0  ;;  %p138_p3 = pnand %p325_p0, %p137_p2 }
   0x6   : > { %p164_p4 = scmp.lt.s32.totalorder (!%p138_p3), %s381_s9, 1  ;;  %v391_v0 = vmov (!%p138_p3), 0   ;;  %vm183_vm0 = vcmask (!%p138_p3), 7168   ;;  %v392_v2 = vmov (!%p138_p3), -inf   ;;  %v188_v3 = vlaneseq (!%p138_p3) }
   0x7   : > { %141 = sbr.rel (%p138_p3) target bundleno = 609 (0x261), region = 28  ;;  %359 = vset.pattern.permute.xlu0 (!%p138_p3), %v391_v0  ;;  %360 = vset.pattern.permute.xlu1 (!%p138_p3), %v391_v0  ;;  %184 = vst.msk [vmem:[#allocation2] sm:$0xff] (!%p138_p3), %vm183_vm0, %v392_v2  ;;  %vm202_vm2 = vcmask (!%p138_p3), 523264   ;;  %v393_v13 = vmov (!%p138_p3), 0.0  }
   0x8   : > { %v189_v5 = vand.u32 (!%p138_p3), 127, %v188_v3  ;;  %186 = vst.msk [vmem:[#allocation4] sm:$0xff] (!%p138_p3), %vm183_vm0, %v393_v13  ;;  %185 = vst.msk [vmem:[#allocation3] sm:$0xff] (!%p138_p3), %vm183_vm0, %v393_v13 }
   0xe   : > { %s468_s9 = smov (!%p164_p4, %s381_s9), 1  ;;  %v201_v14 = vld [vmem:[#allocation2] sm:$0xff] }
   0xf   : > { %s427_s13 = sshll.u32 %s468_s9, 3  ;;  %v227_v17 = vld [vmem:[#allocation4] sm:$0xff]  ;;  %v210_v28 = vld [vmem:[#allocation3] sm:$0xff] }
  0x10   : > { %s174_s16 = scalar_lea.vmem %s461_s1, %s427_s13  ;;  %s170_s19 = scalar_lea.vmem %s460_s0, %s427_s13 }
  0x11   : > { %v190_v1 = vld [vmem:[%s174_s16] sm:$0xff]  ;;  %s178_s22 = scalar_lea.vmem %s462_s2, %s427_s13 }
  0x12   : > { %195 = vperm.xlu0 %359, %v190_v1   ;;  %v187_v4 = vld [vmem:[%s170_s19] sm:$0xff] }
  0x13   : > { %v329_v6 = vadd.f32 -0.4, %v187_v4 }
  0x91   : > { %v196_v7 = vpop.permute.xlu0 %195 }
  0x92   : > { %vm197_vm1 = vcmp.eq.s32.totalorder %v189_v5, %v196_v7 }
  0x93   : > { %v199_v8 = vsel %vm197_vm1, %v329_v6, %v187_v4 }
  0x94   : > { %v200_v9 = vmul.f32 30.0, %v199_v8 }
  0x96   : > { %v203_v10 = vsel %vm202_vm2, %v200_v9, -inf  ;;  %v228_v11 = vsel %vm197_vm1, %v200_v9, 0.0 }
  0x97   : > { %204 = vmax.xlane.f32.xlu0 %v203_v10  ;;  %v229_v12 = vsel %vm202_vm2, %v228_v11, 0.0 }
  0x9b   : > { %230 = vadd.xlane.f32.xlu0 %v229_v12 }
 0x124   : > { %v205_v15 = vpop.xlane.xlu0 %204 }
 0x125   : > { %v206_v16 = vmax.f32 %v201_v14, %v205_v15 }
 0x127   : > { %v207_v18 = vsub.f32 %v201_v14, %v206_v16  ;;  %226 = vst.msk [vmem:[#allocation2] sm:$0xff] %vm183_vm0, %v206_v16  ;;  %214 = vperm.xlu1 %360, %v206_v16  }
 0x128   : > { %v231_v19 = vpop.xlane.xlu0 %230 }
 0x129   : > { %v232_v20 = vadd.f32 %v231_v19, %v227_v17  ;;  %v208_v26 = vmul.f32 1.442695, %v207_v18 }
 0x12b   : > { %233 = vst.msk [vmem:[#allocation4] sm:$0xff] %vm183_vm0, %v232_v20 }
 0x12e   : > { %v237_v35 = vld [vmem:[#allocation2] sm:$0xff] }
 0x132   : > { %v242_v37 = vld [vmem:[#allocation4] sm:$0xff] }
 0x1a6   : > { %v215_v21 = vpop.permute.xlu1 %214 }
 0x1a7   : > { %v217_v22 = vsub.f32 %v200_v9, %v215_v21 }
 0x1a9   : > { %v218_v23 = vmul.f32 1.442695, %v217_v22 }
 0x1ab   : > { %361 = vpow2.f32 %v218_v23 }
 0x1ac   : > { %363 = vpow2.f32 %v208_v26 }
 0x1b5   : > { %v362_v24 = vpop.eup %361 }
 0x1b6   : > { %v220_v25 = vsel %vm202_vm2, %v362_v24, 0.0  ;;  %v364_v27 = vpop.eup %363 }
 0x1b7   : > { %221 = vadd.xlane.f32.xlu1 %v220_v25  ;;  %v211_v29 = vmul.f32 %v364_v27, %v210_v28 }
 0x244   : > { %v222_v30 = vpop.xlane.xlu1 %221 }
 0x245   : > { %v223_v31 = vadd.f32 %v222_v30, %v211_v29 }
 0x247   : > { %225 = vst.msk [vmem:[#allocation3] sm:$0xff] %vm183_vm0, %v223_v31 }
 0x24e   : > { %v238_v32 = vld [vmem:[#allocation3] sm:$0xff] }
 0x24f   : > { %365 = vlog2.f32 %v238_v32 }
 0x259   : > { %v366_v33 = vpop.eup %365 }
 0x25a   : > { %v240_v34 = vmul.f32 0.6931472, %v366_v33 }
 0x25c   : > { %v241_v36 = vadd.f32 %v240_v34, %v237_v35 }
 0x25e   : > { %v243_v38 = vsub.f32 %v241_v36, %v242_v37 }
 0x260   : > { %244 = vst.msk [vmem:[%s178_s22] sm:$0xff] %vm183_vm0, %v243_v38 }
 0x261 PF: > { %s12_s11 = sadd.s32 1, %s389_s11   ;;  %s463_s9 = smov %s385_s10 }
 0x262   : > { %p9_p5 = scmp.ge.s32.totalorder %s12_s11, 4   ;;  %s464_s10 = smov %s466_s12 }
 0x264   :  { %11 = sbr.rel (!%p9_p5) target bundleno = 2 (0x2), region = 69 }

</bundles_post_ra>
